<compile_context>
chip_gen: v6e
topology: v6e:2x2x1
jax: 0.10.0
libtpu: 0.0.40
codegen_flags: <defaults>
</compile_context>

<pallas_src>
import functools

import jax
import jax.numpy as jnp
from jax.experimental import pallas as pl
from jax.experimental.pallas import tpu as pltpu


def _round_up(x: int, m: int) -> int:
    return ((x + m - 1) // m) * m


def _nll_loss_kernel(x_ref, t_ref, out_ref, acc_ref, *,
                     beta: float, n_total: int, blocks_per_group: int):
    g_id = pl.program_id(0)      # row group ("parallel": splits across v7x TCs)
    step = pl.program_id(1)      # step within group ("arbitrary": accumulator)
    nsteps = pl.num_programs(1)

    @pl.when(step == 0)
    def _init():
        acc_ref[...] = jnp.zeros_like(acc_ref)

    x = x_ref[...]                                   # (TM, C), native dtype
    t = t_ref[...]                                   # (TM, 1), int32
    tm, c = x.shape

    # --- gather(inputs, dim=1, index=targets) via one-hot select + row-sum ---
    # Exactly one nonzero per row, so summing in the native dtype is exact;
    # upcast only the (TM, 1) result.
    col_ids = jax.lax.broadcasted_iota(jnp.int32, (tm, c), 1)        # (TM, C)
    energy_c = jnp.sum(jnp.where(col_ids == t, x, 0),
                       axis=1, keepdims=True).astype(jnp.float32)    # (TM, 1)

    # --- free energy: -logsumexp(-beta * x, axis=1) / beta (stable, f32) ---
    all_energy = x.astype(jnp.float32) * jnp.float32(-beta)          # (TM, C)
    m = jnp.max(all_energy, axis=1, keepdims=True)                   # (TM, 1)
    sumexp = jnp.sum(jnp.exp(all_energy - m), axis=1, keepdims=True) # (TM, 1)
    free_energy = -(m + jnp.log(sumexp)) * jnp.float32(1.0 / beta)   # (TM, 1)

    nll = energy_c - free_energy                                     # (TM, 1)

    # --- mask rows past N (tail tile and fully-padded dummy steps) ---
    g_block = g_id * blocks_per_group + step        # global block idx, unclamped
    row_ids = g_block * tm + jax.lax.broadcasted_iota(jnp.int32, (tm, 1), 0)
    nll = jnp.where(row_ids < n_total, nll, 0.0)

    # --- per-group partial sum; wrapper sums groups and divides by true N ---
    acc_ref[...] += jnp.sum(nll, axis=0, keepdims=True)              # (1, 1)

    @pl.when(step == nsteps - 1)
    def _finalize():
        out_ref[...] = acc_ref[...].reshape(1, 1, 1)


def _vmem_budget_bytes():
    """Generation-aware (vmem_limit_bytes, tile-sizing budget)."""
    try:
        cap = int(pltpu.get_tpu_info().vmem_capacity_bytes)
    except Exception:
        cap = 64 * 1024 * 1024                      # conservative: v7x per-TC VMEM
    limit = min((cap * 3) // 4, 96 * 1024 * 1024)   # ~48 MiB v7x, ~96 MiB v5e/v6e
    budget = max(limit - 8 * 1024 * 1024, 8 * 1024 * 1024)  # compiler headroom
    return int(limit), int(budget)


def _choose_tile_rows(n: int, c: int, itemsize: int, budget_bytes: int) -> int:
    """Budget-driven TM (no fixed row cap), lane-padding aware.

    Per-row VMEM cost:
      * double-buffered input tile, lane-padded:      2 * roundup(C,128) * itemsize
      * live f32/int32 temporaries (~3 (TM,C) arrays): ~12 * roundup(C,128)
      * double-buffered (TM,1) int32 targets, padded to 128 lanes: 2*128*4 = 1024
    """
    c_pad = _round_up(c, 128)
    bytes_per_row = c_pad * (2 * itemsize + 12) + 1024
    row_align = 8 * max(1, 4 // itemsize)            # 8 f32 / 16 bf16 / 32 int8-fp8
    tm = budget_bytes // bytes_per_row
    tm = max(row_align, (tm // row_align) * row_align)
    if tm >= n:
        tm = n                                       # full array: always legal
    return int(tm)


def nll_loss(inputs: jax.Array, targets: jax.Array, beta: float,
             *, tile_rows: int | None = None) -> jax.Array:
    """inputs: (N, C) float (any float dtype), targets: (N,) int, beta > 0."""
    assert beta > 0, "beta for energy calculate must be larger than 0"
    n, c = inputs.shape
    t2 = targets.astype(jnp.int32).reshape(n, 1)     # tiny (N, 1) int32 side input

    itemsize = jnp.dtype(inputs.dtype).itemsize
    vmem_limit, budget = _vmem_budget_bytes()
    tm = int(tile_rows) if tile_rows is not None else _choose_tile_rows(
        n, c, itemsize, budget)
    tm = min(tm, n)

    nb = pl.cdiv(n, tm)                              # total row blocks
    num_groups = 2 if nb >= 2 else 1                 # 2 TCs on v7x; neutral elsewhere
    bpg = pl.cdiv(nb, num_groups)                    # blocks (steps) per group

    def in_index_map(g, i):
        # Clamp so the last (possibly dummy) step of the last group never DMAs
        # a fully out-of-bounds block; its rows are masked in-kernel anyway.
        return (jnp.minimum(g * bpg + i, nb - 1), 0)

    kernel = functools.partial(_nll_loss_kernel, beta=float(beta),
                               n_total=n, blocks_per_group=bpg)

    partials = pl.pallas_call(
        kernel,
        out_shape=jax.ShapeDtypeStruct((num_groups, 1, 1), jnp.float32),
        grid=(num_groups, bpg),
        in_specs=[
            pl.BlockSpec((tm, c), in_index_map, memory_space=pltpu.VMEM),
            pl.BlockSpec((tm, 1), in_index_map, memory_space=pltpu.VMEM),
        ],
        out_specs=pl.BlockSpec((1, 1, 1), lambda g, i: (g, 0, 0),
                               memory_space=pltpu.VMEM),
        scratch_shapes=[pltpu.VMEM((1, 1), jnp.float32)],
        compiler_params=pltpu.CompilerParams(
            dimension_semantics=("parallel", "arbitrary"),
            vmem_limit_bytes=vmem_limit,
        ),
    )(inputs, t2)

    return jnp.sum(partials) / jnp.float32(n)


def _reference(inputs, targets, beta):
    # Plain-JAX mirror of the PyTorch forward (compute in f32, like the kernel).
    x = inputs.astype(jnp.float32)
    idx = targets.astype(jnp.int32)[:, None]
    energy_c = jnp.take_along_axis(x, idx, axis=1)
    all_energy = -1.0 * beta * x
    free_energy = -1.0 * jax.scipy.special.logsumexp(
        all_energy, axis=1, keepdims=True) / beta
    return jnp.mean(energy_c - free_energy)


if __name__ == "__main__":
    key = jax.random.PRNGKey(0)
    beta = 0.5  # args.energy_beta (deterministic, > 0)

    # (N, C, dtype, tile_rows override). Case 1 exercises the budget-driven
    # single-block path; cases 2/3 force a multi-step grid with the 2-group
    # split, a masked tail tile and (odd block count) a clamped dummy step,
    # plus a bf16 input.
    cases = [
        (8, 32, jnp.float32, None),
        (72, 32, jnp.float32, 16),
        (40, 128, jnp.bfloat16, 16),
    ]

    for case_idx, (n, c, dtype, tile_rows) in enumerate(cases):
        key, k_x, k_t = jax.random.split(key, 3)
        x = jax.random.normal(k_x, (n, c), dtype=jnp.float32).astype(dtype)
        targets = jax.random.randint(k_t, (n,), 0, c, dtype=jnp.int32)

        loss = nll_loss(x, targets, beta, tile_rows=tile_rows)
        jax.block_until_ready(loss)

        ref = _reference(x, targets, beta)
        assert jnp.allclose(loss, ref, atol=1e-5, rtol=1e-5), (case_idx, loss, ref)

    print("KERNEL_OK")
</pallas_src>

<mosaic_0001>
module attributes {stable_mosaic.version = 11 : i64} {
  func.func @_nll_loss_kernel(%arg0: i32, %arg1: i32, %arg2: memref<8x32xf32, #tpu.memory_space<vmem>>, %arg3: memref<8x1xi32, #tpu.memory_space<vmem>>, %arg4: memref<1x1x1xf32, #tpu.memory_space<vmem>>, %arg5: memref<1x1xf32, #tpu.memory_space<vmem>>) attributes {dimension_semantics = [#tpu.dimension_semantics<parallel>, #tpu.dimension_semantics<arbitrary>], iteration_bounds = array<i64: 1, 1>, scalar_prefetch = 0 : i64, scratch_operands = 1 : i64, tpu.core_type = #tpu.core_type<tc>, window_params = [{transform_indices = @transform_0, window_bounds = array<i64: 8, 32>}, {transform_indices = @transform_1, window_bounds = array<i64: 8, 1>}, {transform_indices = @transform_2, window_bounds = array<i64: 1, 1, 1>}]} {
    %c0_i32 = arith.constant 0 : i32
    %0 = arith.cmpi eq, %arg1, %c0_i32 : i32
    %1 = arith.extui %0 : i1 to i32
    %c0_i32_0 = arith.constant 0 : i32
    %2 = arith.cmpi ne, %1, %c0_i32_0 : i32
    scf.if %2 {
      %cst_19 = arith.constant 0.000000e+00 : f32
      %47 = vector.broadcast %cst_19 : f32 to vector<1x1xf32>
      %c0_20 = arith.constant 0 : index
      %c0_21 = arith.constant 0 : index
      %48 = vector.load %arg5[%c0_20, %c0_21] : memref<1x1xf32, #tpu.memory_space<vmem>>, vector<1x1xf32>
      tpu.vector_store %arg5[%c0_20, %c0_21], %47 {strides = array<i32>} : memref<1x1xf32, #tpu.memory_space<vmem>>, vector<1x1xf32>,
    } else {
    }
    %c0 = arith.constant 0 : index
    %c0_1 = arith.constant 0 : index
    %3 = vector.load %arg2[%c0, %c0_1] : memref<8x32xf32, #tpu.memory_space<vmem>>, vector<8x32xf32>
    %c0_2 = arith.constant 0 : index
    %c0_3 = arith.constant 0 : index
    %4 = vector.load %arg3[%c0_2, %c0_3] : memref<8x1xi32, #tpu.memory_space<vmem>>, vector<8x1xi32>
    %5 = tpu.iota {dimensions = array<i32: 1>} : vector<8x32xi32>
    %6 = vector.broadcast %4 : vector<8x1xi32> to vector<8x32xi32>
    %7 = arith.cmpi eq, %5, %6 : vector<8x32xi32>
    %c0_i32_4 = arith.constant 0 : i32
    %8 = arith.sitofp %c0_i32_4 : i32 to f32
    %9 = vector.broadcast %8 : f32 to vector<8x32xf32>
    %10 = arith.select %7, %3, %9 : vector<8x32xi1>, vector<8x32xf32>
    %cst = arith.constant dense<0.000000e+00> : vector<8xf32>
    %11 = vector.multi_reduction <add>, %10, %cst [1] : vector<8x32xf32> to vector<8xf32>
    %12 = vector.shape_cast %11 : vector<8xf32> to vector<8x1xf32>
    %cst_5 = arith.constant -5.000000e-01 : f32
    %13 = vector.broadcast %cst_5 : f32 to vector<8x32xf32>
    %14 = arith.mulf %3, %13 : vector<8x32xf32>
    %cst_6 = arith.constant dense<0xFF800000> : vector<8xf32>
    %15 = vector.multi_reduction <maximumf>, %14, %cst_6 [1] : vector<8x32xf32> to vector<8xf32>
    %16 = vector.shape_cast %15 : vector<8xf32> to vector<8x1xf32>
    %17 = vector.broadcast %16 : vector<8x1xf32> to vector<8x32xf32>
    %18 = arith.subf %14, %17 : vector<8x32xf32>
    %19 = math.exp %18 : vector<8x32xf32>
    %cst_7 = arith.constant dense<0.000000e+00> : vector<8xf32>
    %20 = vector.multi_reduction <add>, %19, %cst_7 [1] : vector<8x32xf32> to vector<8xf32>
    %21 = vector.shape_cast %20 : vector<8xf32> to vector<8x1xf32>
    %22 = math.log %21 : vector<8x1xf32>
    %23 = arith.addf %16, %22 : vector<8x1xf32>
    %cst_8 = arith.constant 0.000000e+00 : f32
    %24 = vector.broadcast %cst_8 : f32 to vector<8x1xf32>
    %25 = arith.subf %24, %23 : vector<8x1xf32>
    %cst_9 = arith.constant 2.000000e+00 : f32
    %26 = vector.broadcast %cst_9 : f32 to vector<8x1xf32>
    %27 = arith.mulf %25, %26 : vector<8x1xf32>
    %28 = arith.subf %12, %27 : vector<8x1xf32>
    %c1_i32 = arith.constant 1 : i32
    %29 = arith.muli %arg0, %c1_i32 : i32
    %30 = arith.addi %29, %arg1 : i32
    %c8_i32 = arith.constant 8 : i32
    %31 = arith.muli %30, %c8_i32 : i32
    %32 = tpu.iota {dimensions = array<i32: 0>} : vector<8x1xi32>
    %33 = vector.broadcast %31 : i32 to vector<8x1xi32>
    %34 = arith.addi %33, %32 : vector<8x1xi32>
    %c8_i32_10 = arith.constant 8 : i32
    %35 = vector.broadcast %c8_i32_10 : i32 to vector<8x1xi32>
    %36 = arith.cmpi slt, %34, %35 : vector<8x1xi32>
    %cst_11 = arith.constant 0.000000e+00 : f32
    %37 = vector.broadcast %cst_11 : f32 to vector<8x1xf32>
    %38 = arith.select %36, %28, %37 : vector<8x1xi1>, vector<8x1xf32>
    %c0_12 = arith.constant 0 : index
    %c0_13 = arith.constant 0 : index
    %39 = vector.load %arg5[%c0_12, %c0_13] : memref<1x1xf32, #tpu.memory_space<vmem>>, vector<1x1xf32>
    %cst_14 = arith.constant dense<0.000000e+00> : vector<1xf32>
    %40 = vector.multi_reduction <add>, %38, %cst_14 [0] : vector<8x1xf32> to vector<1xf32>
    %41 = vector.shape_cast %40 : vector<1xf32> to vector<1x1xf32>
    %42 = arith.addf %39, %41 : vector<1x1xf32>
    %c0_15 = arith.constant 0 : index
    %c0_16 = arith.constant 0 : index
    %43 = vector.load %arg5[%c0_15, %c0_16] : memref<1x1xf32, #tpu.memory_space<vmem>>, vector<1x1xf32>
    tpu.vector_store %arg5[%c0_15, %c0_16], %42 {strides = array<i32>} : memref<1x1xf32, #tpu.memory_space<vmem>>, vector<1x1xf32>,
    %c0_i32_17 = arith.constant 0 : i32
    %44 = arith.cmpi eq, %arg1, %c0_i32_17 : i32
    %45 = arith.extui %44 : i1 to i32
    %c0_i32_18 = arith.constant 0 : i32
    %46 = arith.cmpi ne, %45, %c0_i32_18 : i32
    scf.if %46 {
      %c0_19 = arith.constant 0 : index
      %c0_20 = arith.constant 0 : index
      %47 = vector.load %arg5[%c0_19, %c0_20] : memref<1x1xf32, #tpu.memory_space<vmem>>, vector<1x1xf32>
      %48 = vector.shape_cast %47 : vector<1x1xf32> to vector<1x1x1xf32>
      %c0_21 = arith.constant 0 : index
      %c0_22 = arith.constant 0 : index
      %c0_23 = arith.constant 0 : index
      %49 = vector.load %arg4[%c0_21, %c0_22, %c0_23] : memref<1x1x1xf32, #tpu.memory_space<vmem>>, vector<1x1x1xf32>
      tpu.vector_store %arg4[%c0_21, %c0_22, %c0_23], %48 {strides = array<i32>} : memref<1x1x1xf32, #tpu.memory_space<vmem>>, vector<1x1x1xf32>,
    } else {
    }
    return
  }
  func.func @transform_0(%arg0: i32, %arg1: i32) -> (i32, i32) {
    %c1_i32 = arith.constant 1 : i32
    %0 = arith.muli %arg0, %c1_i32 : i32
    %1 = arith.addi %0, %arg1 : i32
    %c0_i32 = arith.constant 0 : i32
    %2 = arith.minsi %1, %c0_i32 : i32
    %c0_i32_0 = arith.constant 0 : i32
    %c0_i32_1 = arith.constant 0 : i32
    return %2, %c0_i32_0 : i32, i32
  }
  func.func @transform_1(%arg0: i32, %arg1: i32) -> (i32, i32) {
    %c1_i32 = arith.constant 1 : i32
    %0 = arith.muli %arg0, %c1_i32 : i32
    %1 = arith.addi %0, %arg1 : i32
    %c0_i32 = arith.constant 0 : i32
    %2 = arith.minsi %1, %c0_i32 : i32
    %c0_i32_0 = arith.constant 0 : i32
    %c0_i32_1 = arith.constant 0 : i32
    return %2, %c0_i32_0 : i32, i32
  }
  func.func @transform_2(%arg0: i32, %arg1: i32) -> (i32, i32, i32) {
    %c0_i32 = arith.constant 0 : i32
    %c0_i32_0 = arith.constant 0 : i32
    %c0_i32_1 = arith.constant 0 : i32
    return %arg0, %c0_i32, %c0_i32_0 : i32, i32, i32
  }
}

</mosaic_0001>

<bundles_post_ra>
// kernel: tpu_custom_call.1
= control target key start
LH: loop header
LB: loop body
LE: loop exit
PB: predicated region body
PF: predicated region fallthrough
CT: control target
= control target key end

     0   :  { %vm81_vm0 = vcmask 261120   ;;  %s213_s0 = inlined_call_operand.vmem [shape: f32[8,32], index: 0, kind: input, shape index: {}]   ;;  %s214_s1 = inlined_call_operand.vmem [shape: s32[8,1], index: 1, kind: input, shape index: {}]   ;;  %s215_s2 = inlined_call_operand.hbm [shape: f32[1,1,1], index: 2, kind: output, shape index: {}]  }
   0x1   :  { %v72_v0 = vld [vmem:[%s213_s0] sm:$0xff] }
   0x2   :  { %7 = vsyncpa [#allocation4], 0  ;;  %v85_v1 = vmul.f32 -0.5, %v72_v0  ;;  %v180_v2 = vmov 0   ;;  %v73_v4 = vld [vmem:[%s214_s1] sm:$0xff]  ;;  %v74_v8 = vlaneseq  ;;  %vm70_vm2 = vcmask 0  }
   0x3   :  { %153 = vset.pattern.permute.xlu0 %v180_v2  ;;  %v181_v15 = vmov 0.0   ;;  %s182_s0 = smov [#allocation3]  }
   0x4   :  { %v86_v3 = vsel %vm81_vm0, %v85_v1, -inf  ;;  %v75_v9 = vand.u32 127, %v74_v8  ;;  %71 = vst.msk [vmem:[#allocation2] sm:$0x1] %vm70_vm2, %v181_v15  ;;  %s130_s1 = sshll.u32 %s182_s0, 4  ;;  %s131_s1 = int_to_ptr.vmem [resolvable:$true] %s130_s1 }
   0x5   :  { %87 = vmax.xlane.f32.xlu0 %v86_v3  ;;  %s158_s13 = scalar_lea.vmem %s131_s1, 16  ;;  %s162_s14 = scalar_lea.vmem %s131_s1, 32 }
   0x6   :  { %p159_p0 = scmp.ne.s32.totalorder %s131_s1, %s158_s13  ;;  %p163_p1 = scmp.lt.s32.totalorder %s131_s1, %s131_s1 }
   0x7   :  { %p164_p2 = scmp.lt.s32.totalorder %s162_s14, %s158_s13 }
   0x9   :  { %p165_p3 = por %p164_p2, %p163_p1 }
   0xb   :  { %v109_v29 = vld [vmem:[#allocation2] sm:$0x1]  ;;  %p166_p4 = pnand %p165_p3, %p159_p0 }
  0x1b   :  { %77 = vperm.xlu0 %153, %v73_v4  }
  0x8e   :  { %v88_v5 = vpop.xlane.xlu0 %87 }
  0x8f   :  { %v89_v6 = vsub.f32 %v85_v1, %v88_v5 }
  0x91   :  { %v90_v7 = vmul.f32 1.442695, %v89_v6 }
  0x93   :  { %154 = vpow2.f32 %v90_v7 }
  0x96   :  { %v78_v10 = vpop.permute.xlu0 %77 }
  0x97   :  { %vm79_vm1 = vcmp.eq.s32.totalorder %v75_v9, %v78_v10 }
  0x98   :  { %v80_v12 = vsel %vm79_vm1, %v72_v0, 0.0 }
  0x99   :  { %v82_v14 = vsel %vm81_vm0, %v80_v12, 0.0 }
  0xa0   :  { %v155_v11 = vpop.eup %154 }
  0xa1   :  { %v92_v13 = vsel %vm81_vm0, %v155_v11, 0.0 }
  0xa2   :  { %93 = vadd.xlane.f32.xlu1 %v92_v13 }
  0xa6   :  { %83 = vadd.xlane.f32.xlu1 %v82_v14 }
 0x12b   :  { %v94_v16 = vpop.xlane.xlu1 %93 }
 0x12c   :  { %156 = vlog2.f32 %v94_v16 }
 0x12f   :  { %v84_v21 = vpop.xlane.xlu1 %83 }
 0x139   :  { %v157_v17 = vpop.eup %156 }
 0x13a   :  { %v96_v18 = vmul.f32 0.6931472, %v157_v17 }
 0x13c   :  { %v97_v19 = vadd.f32 %v96_v18, %v88_v5 }
 0x13e   :  { %v98_v20 = vsub.f32 0.0, %v97_v19 }
 0x140   :  { %v99_v22 = vmul.f32 2.0, %v98_v20 }
 0x142   :  { %v100_v23 = vsub.f32 %v84_v21, %v99_v22 }
 0x144   :  { %v110_v24 = vrot.slane %v100_v23, 4 }
 0x146   :  { %v111_v25 = vadd.f32 %v110_v24, %v100_v23 }
 0x148   :  { %v112_v26 = vrot.slane %v111_v25, 2 }
 0x14a   :  { %v113_v27 = vadd.f32 %v112_v26, %v111_v25 }
 0x14c   :  { %v114_v28 = vrot.slane %v113_v27, 1 }
 0x14e   :  { %v115_v30 = vadd.f32 %v114_v28, %v113_v27 }
 0x150   :  { %v116_v31 = vadd.f32 %v115_v30, %v109_v29 }
 0x152   :  { %118 = vst.msk [vmem:[#allocation2] sm:$0x1] %vm70_vm2, %v116_v31 }
 0x159   :  { %v122_v32 = vld [vmem:[#allocation2] sm:$0x1] }
 0x15a   :  { %123 = vst.msk [vmem:[#allocation3] sm:$0x1] %vm70_vm2, %v122_v32 }
 0x15b   :  { %169 = shalt.err (!%p166_p4)
}
 0x15c   :  { %133 = dma.vmem_to_hbm [thread:$0]  %s131_s1, 16, %s215_s2, [#allocation4]  }
 0x15d   :  { %178 = dma.done.wait [#allocation4], 16  }
 0x15e   :  { %179 = vsyncadd [#allocation4], 4294967280 }
 0x15f   :  { %137 = vsyncpa [#allocation4], 1 }

</bundles_post_ra>
